<compile_context>
chip_gen: v7x
topology: tpu7x:2x2x1
jax: 0.10.0
libtpu: 0.0.40
codegen_flags: <defaults>
</compile_context>

<pallas_src>
import numpy as np
import jax
import jax.numpy as jnp
from jax.experimental import pallas as pl
from jax.experimental.pallas import tpu as pltpu


# ---------------------------------------------------------------------------
# Pallas kernel
# ---------------------------------------------------------------------------
def _make_kernel(alpha: float, gamma: float, B_true: int, L_true: int,
                 TB: int, TL: int, S: int):
    """Return a kernel closure with static hyper-params / shapes baked in."""
    alpha = float(alpha)
    gamma = float(gamma)

    # Avoid float pow (exp+log on the EUP) for common integer gammas.
    if gamma == 2.0:
        def pow_fn(x):
            return x * x
    elif gamma == 1.0:
        def pow_fn(x):
            return x
    elif gamma == int(gamma) and 0.0 <= gamma <= 8.0:
        _g = int(gamma)

        def pow_fn(x):
            r = jnp.ones_like(x)
            for _ in range(_g):
                r = r * x
            return r
    else:
        def pow_fn(x):
            return x ** jnp.float32(gamma)

    def kernel(sl_ref, el_ref, sy_ref, ey_ref,
               span_s_ref, span_e_ref, span_iou_ref,
               out_ref, acc_ref):
        i = pl.program_id(0)          # batch-tile index  (parallel)
        j = pl.program_id(1)          # L-tile index      (arbitrary / reduce)

        @pl.when(j == 0)
        def _zero_acc():
            acc_ref[...] = jnp.zeros_like(acc_ref)

        # ---- validity mask for padded rows / cols -------------------------
        row = i * TB + jax.lax.broadcasted_iota(jnp.int32, (TB, TL), 0)
        col = j * TL + jax.lax.broadcasted_iota(jnp.int32, (TB, TL), 1)
        valid = jnp.logical_and(row < B_true, col < L_true)

        # ---- max IoU over gold spans (shared by start & end branches) -----
        pos = col.astype(jnp.float32)                       # (TB, TL)
        span_s = span_s_ref[...]                            # (TB, S)
        span_e = span_e_ref[...]                            # (TB, S)
        span_iou = span_iou_ref[...]                        # 1/(e-s+1) or 0

        max_iou = jnp.zeros((TB, TL), jnp.float32)
        for k in range(S):                                  # static unroll
            s_k = span_s[:, k:k + 1]                        # (TB, 1)
            e_k = span_e[:, k:k + 1]
            v_k = span_iou[:, k:k + 1]
            inside = jnp.logical_and(s_k <= pos, pos <= e_k)
            max_iou = jnp.maximum(max_iou, jnp.where(inside, v_k, 0.0))

        w_neg = alpha * pow_fn(1.0 + max_iou)               # (TB, TL)

        def bce_with_logits(x, y):
            # numerically stable, matches F.binary_cross_entropy_with_logits
            return jnp.maximum(x, 0.0) - x * y + jnp.log1p(jnp.exp(-jnp.abs(x)))

        def weighted(logit_ref, label_ref):
            x = logit_ref[...].astype(jnp.float32)
            y = label_ref[...].astype(jnp.float32)          # exactly 0.0 / 1.0
            w = jnp.where(y == 1.0, 1.0 - alpha, w_neg)
            return w * bce_with_logits(x, y)

        contrib = weighted(sl_ref, sy_ref) + weighted(el_ref, ey_ref)
        contrib = jnp.where(valid, contrib, 0.0)

        # ---- fold (TB, TL) tile into the (8, 128) accumulator -------------
        # vreg-aligned slices -> pure element-wise VPU adds, no XLU reduce.
        part = acc_ref[...]
        for r in range(TB // 8):
            for c in range(TL // 128):
                part = part + contrib[r * 8:(r + 1) * 8, c * 128:(c + 1) * 128]
        acc_ref[...] = part

        # ---- finalize: emit the per-batch-tile partial sums ----------------
        @pl.when(j == pl.num_programs(1) - 1)
        def _finalize():
            out_ref[0] = acc_ref[...]

    return kernel


# ---------------------------------------------------------------------------
# Python wrapper (host glue: quads -> padded dense arrays, one pallas_call)
# ---------------------------------------------------------------------------
def _round_up(x: int, m: int) -> int:
    return ((x + m - 1) // m) * m


def span_iou_weighted_loss(start_logits, end_logits, quads_labels,
                           *, alpha=0.25, gamma=2.0, span_type="target"):
    B, L = start_logits.shape

    # Padded / tiled sizes.  bf16 native tiling is (16, 128).
    Bp = _round_up(max(B, 1), 16)
    Lp = _round_up(max(L, 1), 128)
    TB = next(t for t in (64, 32, 16) if Bp % t == 0)
    TL = next(t for t in (2048, 1024, 512, 256, 128) if Lp % t == 0)
    nb, nl = Bp // TB, Lp // TL

    # --- host glue: labels and packed gold spans (pure setup, numpy) --------
    start_labels = np.zeros((Bp, Lp), np.float32)
    end_labels = np.zeros((Bp, Lp), np.float32)
    gold_spans = [[] for _ in range(B)]
    for b, quads_list in enumerate(quads_labels):
        for quad in quads_list:
            if span_type == "target":
                s, e = int(quad["t_start_token"]), int(quad["t_end_token"])
            elif span_type == "argument":
                s, e = int(quad["a_start_token"]), int(quad["a_end_token"])
            else:
                raise ValueError(f"Invalid span_type: {span_type}")
            if 0 <= s < L:
                start_labels[b, s] = 1.0
            if 0 <= e < L:
                end_labels[b, e] = 1.0
            if 0 <= s <= e < L:
                gold_spans[b].append((s, e))

    S = max(1, max(len(sp) for sp in gold_spans))
    span_s = np.zeros((Bp, S), np.float32)
    span_e = np.full((Bp, S), -1.0, np.float32)     # empty span: never "inside"
    span_iou = np.zeros((Bp, S), np.float32)        # 0 -> cannot raise max_iou
    for b, spans in enumerate(gold_spans):
        for k, (s, e) in enumerate(spans):
            span_s[b, k] = float(s)
            span_e[b, k] = float(e)
            span_iou[b, k] = 1.0 / (e - s + 1.0)    # IoU when token is inside

    sl = np.zeros((Bp, Lp), np.float32)
    el = np.zeros((Bp, Lp), np.float32)
    sl[:B, :L] = np.asarray(start_logits, np.float32)
    el[:B, :L] = np.asarray(end_logits, np.float32)

    kernel = _make_kernel(float(alpha), float(gamma), B, L, TB, TL, S)

    tile_spec = pl.BlockSpec((TB, TL), lambda i, j: (i, j))
    # span arrays: constant over the L-tile axis -> fetched once per B-tile
    span_spec = pl.BlockSpec((TB, S), lambda i, j: (i, 0))

    grid_spec = pltpu.PrefetchScalarGridSpec(
        num_scalar_prefetch=0,
        grid=(nb, nl),
        in_specs=[tile_spec, tile_spec, tile_spec, tile_spec,
                  span_spec, span_spec, span_spec],
        out_specs=pl.BlockSpec((1, 8, 128), lambda i, j: (i, 0, 0)),
        scratch_shapes=[pltpu.VMEM((8, 128), jnp.float32)],
    )

    partials = pl.pallas_call(
        kernel,
        out_shape=jax.ShapeDtypeStruct((nb, 8, 128), jnp.float32),
        grid_spec=grid_spec,
        compiler_params=pltpu.CompilerParams(
            dimension_semantics=("parallel", "arbitrary"),
            vmem_limit_bytes=32 * 1024 * 1024,
        ),
    )(
        jnp.asarray(sl, jnp.bfloat16),          # bf16 logits: 2x less HBM
        jnp.asarray(el, jnp.bfloat16),
        jnp.asarray(start_labels, jnp.bfloat16),  # 0/1 exact in bf16
        jnp.asarray(end_labels, jnp.bfloat16),
        jnp.asarray(span_s),
        jnp.asarray(span_e),
        jnp.asarray(span_iou),
    )
    # tiny finishing reduction over (nb, 8, 128) partial sums, true-size mean
    return jnp.sum(partials) / jnp.float32(B * L)


# ---------------------------------------------------------------------------
# Pure-numpy reference (mirrors the PyTorch forward), for verification
# ---------------------------------------------------------------------------
def _reference(start_logits, end_logits, quads_labels,
               alpha=0.25, gamma=2.0, span_type="target"):
    start_logits = np.asarray(start_logits, np.float64)
    end_logits = np.asarray(end_logits, np.float64)
    B, L = start_logits.shape
    start_labels = np.zeros((B, L))
    end_labels = np.zeros((B, L))
    gold = [[] for _ in range(B)]
    for b, quads in enumerate(quads_labels):
        for q in quads:
            s, e = int(q["t_start_token"]), int(q["t_end_token"])
            if 0 <= s < L:
                start_labels[b, s] = 1.0
            if 0 <= e < L:
                end_labels[b, e] = 1.0
            if 0 <= s <= e < L:
                gold[b].append((s, e))

    def bce(x, y):
        return np.maximum(x, 0) - x * y + np.log1p(np.exp(-np.abs(x)))

    def weights(labels):
        w = np.zeros((B, L))
        for b in range(B):
            for i in range(L):
                if labels[b, i] == 1:
                    w[b, i] = 1 - alpha
                else:
                    m = 0.0
                    for s, e in gold[b]:
                        inter = 1 if s <= i <= e else 0
                        union = e - s + 1 + 1 - inter
                        iou = inter / union if union > 0 else 0.0
                        m = max(m, iou)
                    w[b, i] = alpha * (1 + m) ** gamma
        return w

    ls = (weights(start_labels) * bce(start_logits, start_labels)).mean()
    le = (weights(end_labels) * bce(end_logits, end_labels)).mean()
    return ls + le


# ---------------------------------------------------------------------------
if __name__ == "__main__":
    B, L = 2, 16
    key = jax.random.PRNGKey(0)
    k1, k2 = jax.random.split(key)
    # Round inputs to bf16 up front so the kernel's bf16 streaming path is
    # lossless w.r.t. the float64 reference.
    start_logits = jax.random.normal(k1, (B, L), jnp.float32)
    end_logits = jax.random.normal(k2, (B, L), jnp.float32)
    start_logits = start_logits.astype(jnp.bfloat16).astype(jnp.float32)
    end_logits = end_logits.astype(jnp.bfloat16).astype(jnp.float32)

    # deterministic synthetic quad labels (plain Python ints, like .item())
    quads_labels = [
        [
            {"t_start_token": 2, "t_end_token": 5,
             "a_start_token": 1, "a_end_token": 3},
            {"t_start_token": 9, "t_end_token": 12,
             "a_start_token": 8, "a_end_token": 10},
        ],
        [
            {"t_start_token": 0, "t_end_token": 4,
             "a_start_token": 6, "a_end_token": 7},
        ],
    ]

    loss = span_iou_weighted_loss(start_logits, end_logits, quads_labels,
                                  alpha=0.25, gamma=2.0, span_type="target")
    loss = jax.block_until_ready(loss)

    ref = _reference(np.asarray(start_logits), np.asarray(end_logits),
                     quads_labels, alpha=0.25, gamma=2.0)
    np.testing.assert_allclose(float(loss), float(ref), rtol=1e-4, atol=1e-5)
    print("KERNEL_OK")
</pallas_src>

<mosaic_0001>
module attributes {stable_mosaic.version = 11 : i64} {
  func.func @kernel(%arg0: i32, %arg1: i32, %arg2: memref<16x128xbf16, #tpu.memory_space<vmem>>, %arg3: memref<16x128xbf16, #tpu.memory_space<vmem>>, %arg4: memref<16x128xbf16, #tpu.memory_space<vmem>>, %arg5: memref<16x128xbf16, #tpu.memory_space<vmem>>, %arg6: memref<16x2xf32, #tpu.memory_space<vmem>>, %arg7: memref<16x2xf32, #tpu.memory_space<vmem>>, %arg8: memref<16x2xf32, #tpu.memory_space<vmem>>, %arg9: memref<1x8x128xf32, #tpu.memory_space<vmem>>, %arg10: memref<8x128xf32, #tpu.memory_space<vmem>>) attributes {dimension_semantics = [#tpu.dimension_semantics<parallel>, #tpu.dimension_semantics<arbitrary>], iteration_bounds = array<i64: 1, 1>, scalar_prefetch = 0 : i64, scratch_operands = 1 : i64, tpu.core_type = #tpu.core_type<tc>, window_params = [{transform_indices = @transform_0, window_bounds = array<i64: 16, 128>}, {transform_indices = @transform_1, window_bounds = array<i64: 16, 128>}, {transform_indices = @transform_2, window_bounds = array<i64: 16, 128>}, {transform_indices = @transform_3, window_bounds = array<i64: 16, 128>}, {transform_indices = @transform_4, window_bounds = array<i64: 16, 2>}, {transform_indices = @transform_5, window_bounds = array<i64: 16, 2>}, {transform_indices = @transform_6, window_bounds = array<i64: 16, 2>}, {transform_indices = @transform_7, window_bounds = array<i64: 1, 8, 128>}]} {
    %c0_i32 = arith.constant 0 : i32
    %0 = arith.cmpi eq, %arg1, %c0_i32 : i32
    %1 = arith.extui %0 : i1 to i32
    %c0_i32_0 = arith.constant 0 : i32
    %2 = arith.cmpi ne, %1, %c0_i32_0 : i32
    scf.if %2 {
      %cst_34 = arith.constant 0.000000e+00 : f32
      %102 = vector.broadcast %cst_34 : f32 to vector<8x128xf32>
      %c0_35 = arith.constant 0 : index
      %c0_36 = arith.constant 0 : index
      %103 = vector.load %arg10[%c0_35, %c0_36] : memref<8x128xf32, #tpu.memory_space<vmem>>, vector<8x128xf32>
      tpu.vector_store %arg10[%c0_35, %c0_36], %102 {strides = array<i32>} : memref<8x128xf32, #tpu.memory_space<vmem>>, vector<8x128xf32>,
    } else {
    }
    %c16_i32 = arith.constant 16 : i32
    %3 = arith.muli %arg0, %c16_i32 : i32
    %4 = tpu.iota {dimensions = array<i32: 0>} : vector<16x128xi32>
    %5 = vector.broadcast %3 : i32 to vector<16x128xi32>
    %6 = arith.addi %5, %4 : vector<16x128xi32>
    %c128_i32 = arith.constant 128 : i32
    %7 = arith.muli %arg1, %c128_i32 : i32
    %8 = tpu.iota {dimensions = array<i32: 1>} : vector<16x128xi32>
    %9 = vector.broadcast %7 : i32 to vector<16x128xi32>
    %10 = arith.addi %9, %8 : vector<16x128xi32>
    %c2_i32 = arith.constant 2 : i32
    %11 = vector.broadcast %c2_i32 : i32 to vector<16x128xi32>
    %12 = arith.cmpi slt, %6, %11 : vector<16x128xi32>
    %c16_i32_1 = arith.constant 16 : i32
    %13 = vector.broadcast %c16_i32_1 : i32 to vector<16x128xi32>
    %14 = arith.cmpi slt, %10, %13 : vector<16x128xi32>
    %15 = arith.andi %12, %14 : vector<16x128xi1>
    %16 = arith.sitofp %10 : vector<16x128xi32> to vector<16x128xf32>
    %c0 = arith.constant 0 : index
    %c0_2 = arith.constant 0 : index
    %17 = vector.load %arg6[%c0, %c0_2] : memref<16x2xf32, #tpu.memory_space<vmem>>, vector<16x2xf32>
    %c0_3 = arith.constant 0 : index
    %c0_4 = arith.constant 0 : index
    %18 = vector.load %arg7[%c0_3, %c0_4] : memref<16x2xf32, #tpu.memory_space<vmem>>, vector<16x2xf32>
    %c0_5 = arith.constant 0 : index
    %c0_6 = arith.constant 0 : index
    %19 = vector.load %arg8[%c0_5, %c0_6] : memref<16x2xf32, #tpu.memory_space<vmem>>, vector<16x2xf32>
    %cst = arith.constant 0.000000e+00 : f32
    %20 = vector.broadcast %cst : f32 to vector<16x128xf32>
    %21 = vector.extract_strided_slice %17 {offsets = [0, 0], sizes = [16, 1], strides = [1, 1]} : vector<16x2xf32> to vector<16x1xf32>
    %22 = vector.extract_strided_slice %18 {offsets = [0, 0], sizes = [16, 1], strides = [1, 1]} : vector<16x2xf32> to vector<16x1xf32>
    %23 = vector.extract_strided_slice %19 {offsets = [0, 0], sizes = [16, 1], strides = [1, 1]} : vector<16x2xf32> to vector<16x1xf32>
    %24 = vector.broadcast %21 : vector<16x1xf32> to vector<16x128xf32>
    %25 = arith.cmpf ole, %24, %16 : vector<16x128xf32>
    %26 = vector.broadcast %22 : vector<16x1xf32> to vector<16x128xf32>
    %27 = arith.cmpf ole, %16, %26 : vector<16x128xf32>
    %28 = arith.andi %25, %27 : vector<16x128xi1>
    %cst_7 = arith.constant 0.000000e+00 : f32
    %29 = vector.shape_cast %23 : vector<16x1xf32> to vector<16x1xf32>
    %30 = vector.broadcast %29 : vector<16x1xf32> to vector<16x128xf32>
    %31 = vector.broadcast %cst_7 : f32 to vector<16x128xf32>
    %32 = arith.select %28, %30, %31 : vector<16x128xi1>, vector<16x128xf32>
    %33 = arith.maximumf %20, %32 : vector<16x128xf32>
    %34 = vector.extract_strided_slice %17 {offsets = [0, 1], sizes = [16, 1], strides = [1, 1]} : vector<16x2xf32> to vector<16x1xf32>
    %35 = vector.extract_strided_slice %18 {offsets = [0, 1], sizes = [16, 1], strides = [1, 1]} : vector<16x2xf32> to vector<16x1xf32>
    %36 = vector.extract_strided_slice %19 {offsets = [0, 1], sizes = [16, 1], strides = [1, 1]} : vector<16x2xf32> to vector<16x1xf32>
    %37 = vector.broadcast %34 : vector<16x1xf32> to vector<16x128xf32>
    %38 = arith.cmpf ole, %37, %16 : vector<16x128xf32>
    %39 = vector.broadcast %35 : vector<16x1xf32> to vector<16x128xf32>
    %40 = arith.cmpf ole, %16, %39 : vector<16x128xf32>
    %41 = arith.andi %38, %40 : vector<16x128xi1>
    %cst_8 = arith.constant 0.000000e+00 : f32
    %42 = vector.shape_cast %36 : vector<16x1xf32> to vector<16x1xf32>
    %43 = vector.broadcast %42 : vector<16x1xf32> to vector<16x128xf32>
    %44 = vector.broadcast %cst_8 : f32 to vector<16x128xf32>
    %45 = arith.select %41, %43, %44 : vector<16x128xi1>, vector<16x128xf32>
    %46 = arith.maximumf %33, %45 : vector<16x128xf32>
    %cst_9 = arith.constant 1.000000e+00 : f32
    %47 = vector.broadcast %cst_9 : f32 to vector<16x128xf32>
    %48 = arith.addf %47, %46 : vector<16x128xf32>
    %49 = arith.mulf %48, %48 : vector<16x128xf32>
    %cst_10 = arith.constant 2.500000e-01 : f32
    %50 = vector.broadcast %cst_10 : f32 to vector<16x128xf32>
    %51 = arith.mulf %50, %49 : vector<16x128xf32>
    %c0_11 = arith.constant 0 : index
    %c0_12 = arith.constant 0 : index
    %52 = vector.load %arg2[%c0_11, %c0_12] : memref<16x128xbf16, #tpu.memory_space<vmem>>, vector<16x128xbf16>
    %53 = arith.extf %52 : vector<16x128xbf16> to vector<16x128xf32>
    %c0_13 = arith.constant 0 : index
    %c0_14 = arith.constant 0 : index
    %54 = vector.load %arg4[%c0_13, %c0_14] : memref<16x128xbf16, #tpu.memory_space<vmem>>, vector<16x128xbf16>
    %55 = arith.extf %54 : vector<16x128xbf16> to vector<16x128xf32>
    %cst_15 = arith.constant 1.000000e+00 : f32
    %56 = vector.broadcast %cst_15 : f32 to vector<16x128xf32>
    %57 = arith.cmpf oeq, %55, %56 : vector<16x128xf32>
    %cst_16 = arith.constant 7.500000e-01 : f32
    %58 = vector.broadcast %cst_16 : f32 to vector<16x128xf32>
    %59 = arith.select %57, %58, %51 : vector<16x128xi1>, vector<16x128xf32>
    %cst_17 = arith.constant 0.000000e+00 : f32
    %60 = vector.broadcast %cst_17 : f32 to vector<16x128xf32>
    %61 = arith.maximumf %53, %60 : vector<16x128xf32>
    %62 = arith.mulf %53, %55 : vector<16x128xf32>
    %63 = arith.subf %61, %62 : vector<16x128xf32>
    %64 = math.absf %53 : vector<16x128xf32>
    %cst_18 = arith.constant 0.000000e+00 : f32
    %65 = vector.broadcast %cst_18 : f32 to vector<16x128xf32>
    %66 = arith.subf %65, %64 : vector<16x128xf32>
    %67 = math.exp %66 : vector<16x128xf32>
    %68 = math.log1p %67 : vector<16x128xf32>
    %69 = arith.addf %63, %68 : vector<16x128xf32>
    %70 = arith.mulf %59, %69 : vector<16x128xf32>
    %c0_19 = arith.constant 0 : index
    %c0_20 = arith.constant 0 : index
    %71 = vector.load %arg3[%c0_19, %c0_20] : memref<16x128xbf16, #tpu.memory_space<vmem>>, vector<16x128xbf16>
    %72 = arith.extf %71 : vector<16x128xbf16> to vector<16x128xf32>
    %c0_21 = arith.constant 0 : index
    %c0_22 = arith.constant 0 : index
    %73 = vector.load %arg5[%c0_21, %c0_22] : memref<16x128xbf16, #tpu.memory_space<vmem>>, vector<16x128xbf16>
    %74 = arith.extf %73 : vector<16x128xbf16> to vector<16x128xf32>
    %cst_23 = arith.constant 1.000000e+00 : f32
    %75 = vector.broadcast %cst_23 : f32 to vector<16x128xf32>
    %76 = arith.cmpf oeq, %74, %75 : vector<16x128xf32>
    %cst_24 = arith.constant 7.500000e-01 : f32
    %77 = vector.broadcast %cst_24 : f32 to vector<16x128xf32>
    %78 = arith.select %76, %77, %51 : vector<16x128xi1>, vector<16x128xf32>
    %cst_25 = arith.constant 0.000000e+00 : f32
    %79 = vector.broadcast %cst_25 : f32 to vector<16x128xf32>
    %80 = arith.maximumf %72, %79 : vector<16x128xf32>
    %81 = arith.mulf %72, %74 : vector<16x128xf32>
    %82 = arith.subf %80, %81 : vector<16x128xf32>
    %83 = math.absf %72 : vector<16x128xf32>
    %cst_26 = arith.constant 0.000000e+00 : f32
    %84 = vector.broadcast %cst_26 : f32 to vector<16x128xf32>
    %85 = arith.subf %84, %83 : vector<16x128xf32>
    %86 = math.exp %85 : vector<16x128xf32>
    %87 = math.log1p %86 : vector<16x128xf32>
    %88 = arith.addf %82, %87 : vector<16x128xf32>
    %89 = arith.mulf %78, %88 : vector<16x128xf32>
    %90 = arith.addf %70, %89 : vector<16x128xf32>
    %cst_27 = arith.constant 0.000000e+00 : f32
    %91 = vector.broadcast %cst_27 : f32 to vector<16x128xf32>
    %92 = arith.select %15, %90, %91 : vector<16x128xi1>, vector<16x128xf32>
    %c0_28 = arith.constant 0 : index
    %c0_29 = arith.constant 0 : index
    %93 = vector.load %arg10[%c0_28, %c0_29] : memref<8x128xf32, #tpu.memory_space<vmem>>, vector<8x128xf32>
    %94 = vector.extract_strided_slice %92 {offsets = [0, 0], sizes = [8, 128], strides = [1, 1]} : vector<16x128xf32> to vector<8x128xf32>
    %95 = arith.addf %93, %94 : vector<8x128xf32>
    %96 = vector.extract_strided_slice %92 {offsets = [8, 0], sizes = [8, 128], strides = [1, 1]} : vector<16x128xf32> to vector<8x128xf32>
    %97 = arith.addf %95, %96 : vector<8x128xf32>
    %c0_30 = arith.constant 0 : index
    %c0_31 = arith.constant 0 : index
    %98 = vector.load %arg10[%c0_30, %c0_31] : memref<8x128xf32, #tpu.memory_space<vmem>>, vector<8x128xf32>
    tpu.vector_store %arg10[%c0_30, %c0_31], %97 {strides = array<i32>} : memref<8x128xf32, #tpu.memory_space<vmem>>, vector<8x128xf32>,
    %c0_i32_32 = arith.constant 0 : i32
    %99 = arith.cmpi eq, %arg1, %c0_i32_32 : i32
    %100 = arith.extui %99 : i1 to i32
    %c0_i32_33 = arith.constant 0 : i32
    %101 = arith.cmpi ne, %100, %c0_i32_33 : i32
    scf.if %101 {
      %c0_34 = arith.constant 0 : index
      %c0_35 = arith.constant 0 : index
      %102 = vector.load %arg10[%c0_34, %c0_35] : memref<8x128xf32, #tpu.memory_space<vmem>>, vector<8x128xf32>
      %c0_36 = arith.constant 0 : index
      %c0_37 = arith.constant 0 : index
      %c0_38 = arith.constant 0 : index
      %103 = vector.load %arg9[%c0_36, %c0_37, %c0_38] : memref<1x8x128xf32, #tpu.memory_space<vmem>>, vector<1x8x128xf32>
      %104 = vector.shape_cast %103 : vector<1x8x128xf32> to vector<8x128xf32>
      %105 = vector.shape_cast %102 : vector<8x128xf32> to vector<1x8x128xf32>
      tpu.vector_store %arg9[%c0_36, %c0_37, %c0_38], %105 {strides = array<i32>} : memref<1x8x128xf32, #tpu.memory_space<vmem>>, vector<1x8x128xf32>,
    } else {
    }
    return
  }
  func.func @transform_0(%arg0: i32, %arg1: i32) -> (i32, i32) {
    %c0_i32 = arith.constant 0 : i32
    return %arg0, %arg1 : i32, i32
  }
  func.func @transform_1(%arg0: i32, %arg1: i32) -> (i32, i32) {
    %c0_i32 = arith.constant 0 : i32
    return %arg0, %arg1 : i32, i32
  }
  func.func @transform_2(%arg0: i32, %arg1: i32) -> (i32, i32) {
    %c0_i32 = arith.constant 0 : i32
    return %arg0, %arg1 : i32, i32
  }
  func.func @transform_3(%arg0: i32, %arg1: i32) -> (i32, i32) {
    %c0_i32 = arith.constant 0 : i32
    return %arg0, %arg1 : i32, i32
  }
  func.func @transform_4(%arg0: i32, %arg1: i32) -> (i32, i32) {
    %c0_i32 = arith.constant 0 : i32
    %c0_i32_0 = arith.constant 0 : i32
    return %arg0, %c0_i32 : i32, i32
  }
  func.func @transform_5(%arg0: i32, %arg1: i32) -> (i32, i32) {
    %c0_i32 = arith.constant 0 : i32
    %c0_i32_0 = arith.constant 0 : i32
    return %arg0, %c0_i32 : i32, i32
  }
  func.func @transform_6(%arg0: i32, %arg1: i32) -> (i32, i32) {
    %c0_i32 = arith.constant 0 : i32
    %c0_i32_0 = arith.constant 0 : i32
    return %arg0, %c0_i32 : i32, i32
  }
  func.func @transform_7(%arg0: i32, %arg1: i32) -> (i32, i32, i32) {
    %c0_i32 = arith.constant 0 : i32
    %c0_i32_0 = arith.constant 0 : i32
    %c0_i32_1 = arith.constant 0 : i32
    return %arg0, %c0_i32, %c0_i32_0 : i32, i32, i32
  }
}

</mosaic_0001>

<bundles_post_ra>
// kernel: tpu_custom_call.1
= control target key start
LH: loop header
LB: loop body
LE: loop exit
PB: predicated region body
PF: predicated region fallthrough
CT: control target
= control target key end

     0   :  { %v298_v2 = vmov 0   ;;  %s380_s0 = inlined_call_operand.vmem [shape: bf16[16,128], index: 0, kind: input, shape index: {}]   ;;  %s381_s1 = inlined_call_operand.vmem [shape: bf16[16,128], index: 1, kind: input, shape index: {}]   ;;  %s382_s2 = inlined_call_operand.vmem [shape: bf16[16,128], index: 2, kind: input, shape index: {}]   ;;  %s383_s3 = inlined_call_operand.vmem [shape: bf16[16,128], index: 3, kind: input, shape index: {}]   ;;  %s384_s4 = inlined_call_operand.vmem [shape: f32[16,2], index: 4, kind: input, shape index: {}]   ;;  %s385_s5 = inlined_call_operand.vmem [shape: f32[16,2], index: 5, kind: input, shape index: {}]   ;;  %s386_s6 = inlined_call_operand.vmem [shape: f32[16,2], index: 6, kind: input, shape index: {}]   ;;  %s387_s7 = inlined_call_operand.hbm [shape: f32[1,8,128], index: 7, kind: output, shape index: {}]  }
   0x1   :  { %v54_v0 = vld [vmem:[%s386_s6] sm:$0xff]  ;;  %263 = vset.pattern.permute.xlu1 %v298_v2  ;;  %262 = vset.pattern.permute.xlu0 %v298_v2 }
   0x2   :  { %v50_v1 = vld [vmem:[%s384_s4] sm:$0xff] }
   0x3   :  { %12 = vsyncpa [#allocation4], 0  ;;  %84 = vperm.xlu1 %263, %v54_v0   ;;  %58 = vperm.xlu0 %262, %v50_v1   ;;  %v52_v3 = vld [vmem:[%s385_s5] sm:$0xff]  ;;  %v299_v4 = vmov 1   ;;  %v33_v17 = vlaneseq }
   0x4   :  { %v136_v5 = vld [vmem:[%s380_s0] sm:$0xf] }
   0x5   :  { %v184_v6 = vld [vmem:[%s381_s1] sm:$0xf]  ;;  %v138_v7 = vunpack.c.l.bf16 %v136_v5  ;;  %v41_v20 = vand.u32 127, %v33_v17  ;;  %v34_v58 = vshrl.u32 %v33_v17, 7 }
   0x6   :  { %v186_v8 = vunpack.c.l.bf16 %v184_v6  ;;  %v140_v24 = vld [vmem:[%s382_s2] sm:$0xf]  ;;  %s300_s2 = smov [#allocation3]  }
   0x7   :  { %264 = vset.pattern.permute.xlu1 %v299_v4  ;;  %70 = vperm.xlu0 %262, %v52_v3   ;;  %v154_v9 = vand.u32 2147483647, %v138_v7  ;;  %v49_v23 = vcvt.s32.f32 %v41_v20  ;;  %v188_v26 = vld [vmem:[%s383_s3] sm:$0xf]  ;;  %v142_v30 = vunpack.c.l.bf16 %v140_v24  ;;  %v148_v41 = vmax.f32 %v138_v7, 0.0  ;;  %s251_s3 = sshll.u32 %s300_s2, 4  ;;  %s252_s3 = int_to_ptr.vmem [resolvable:$true] %s251_s3 }
   0x8   :  { %97 = vperm.xlu1 %264, %v50_v1   ;;  %v202_v10 = vand.u32 2147483647, %v186_v8  ;;  %v190_v33 = vunpack.c.l.bf16 %v188_v26  ;;  %v196_v43 = vmax.f32 %v186_v8, 0.0  ;;  %vm44_vm10 = vcmp.lt.s32.totalorder %v34_v58, 2  ;;  %s274_s10 = scalar_lea.vmem %s252_s3, 128  ;;  %p279_p1 = scmp.lt.s32.totalorder %s252_s3, %s252_s3 }
   0x9   :  { %v156_v11 = vsub.f32 0.0, %v154_v9  ;;  %v150_v42 = vmul.f32 %v142_v30, %v138_v7  ;;  %vm144_vm8 = vcmp.eq.f32.partialorder %v142_v30, 1.0  ;;  %vm46_vm11 = vcmp.lt.s32.totalorder %v41_v20, 16  ;;  %p275_p0 = scmp.ne.s32.totalorder %s252_s3, %s274_s10  ;;  %p280_p2 = scmp.lt.s32.totalorder %s274_s10, %s274_s10 }
   0xa   :  { %v204_v12 = vsub.f32 0.0, %v202_v10  ;;  %v198_v45 = vmul.f32 %v190_v33, %v186_v8  ;;  %vm192_vm9 = vcmp.eq.f32.partialorder %v190_v33, 1.0  ;;  %vm47_vm12 = vmand %vm44_vm10, %vm46_vm11 }
   0xb   :  { %265 = vset.pattern.permute.xlu0 %v299_v4  ;;  %v158_v13 = vmul.f32 1.442695, %v156_v11  ;;  %v152_v53 = vsub.f32 %v148_v41, %v150_v42  ;;  %p281_p3 = por %p280_p2, %p279_p1 }
   0xc   :  { %119 = vperm.xlu1 %264, %v54_v0   ;;  %107 = vperm.xlu0 %265, %v52_v3   ;;  %v206_v14 = vmul.f32 1.442695, %v204_v12  ;;  %v200_v54 = vsub.f32 %v196_v43, %v198_v45 }
   0xd   :  { %266 = vpow2.f32 %v158_v13  ;;  %p282_p4 = pnand %p281_p3, %p275_p0 }
   0xe   :  { %268 = vpow2.f32 %v206_v14 }
  0x17   :  { %v267_v15 = vpop.eup %266 }
  0x18   :  { %v269_v16 = vpop.eup %268  ;;  %v162_v18 = vadd.f32 1.0, %v267_v15  ;;  %v165_v25 = vmul.f32 -0.5, %v267_v15  ;;  %v168_v38 = vand.u32 2147483647, %v267_v15 }
  0x19   :  { %v210_v19 = vadd.f32 1.0, %v269_v16  ;;  %v213_v27 = vmul.f32 -0.5, %v269_v16  ;;  %v216_v39 = vand.u32 2147483647, %v269_v16 }
  0x1a   :  { %270 = vlog2.f32 %v162_v18  ;;  %v166_v32 = vadd.f32 1.0, %v165_v25  ;;  %vm169_vm6 = vcmp.lt.f32.partialorder %v168_v38, 0.0004427343 }
  0x1b   :  { %272 = vlog2.f32 %v210_v19  ;;  %v214_v35 = vadd.f32 1.0, %v213_v27  ;;  %vm217_vm7 = vcmp.lt.f32.partialorder %v216_v39, 0.0004427343 }
  0x1c   :  { %v167_v44 = vmul.f32 %v267_v15, %v166_v32 }
  0x1d   :  { %v215_v50 = vmul.f32 %v269_v16, %v214_v35 }
  0x24   :  { %v271_v34 = vpop.eup %270 }
  0x25   :  { %v273_v36 = vpop.eup %272  ;;  %v164_v48 = vmul.f32 0.6931472, %v271_v34 }
  0x26   :  { %v212_v49 = vmul.f32 0.6931472, %v273_v36 }
  0x27   :  { %v170_v56 = vsel %vm169_vm6, %v167_v44, %v164_v48 }
  0x28   :  { %v218_v57 = vsel %vm217_vm7, %v215_v50, %v212_v49  ;;  %v180_v60 = vadd.f32 %v170_v56, %v152_v53 }
  0x29   :  { %v228_v61 = vadd.f32 %v218_v57, %v200_v54 }
  0x82   :  { %v59_v21 = vpop.permute.xlu0 %58  ;;  %v85_v22 = vpop.permute.xlu1 %84 }
  0x83   :  { %vm66_vm0 = vcmp.le.f32.partialorder %v59_v21, %v49_v23 }
  0x86   :  { %v71_v28 = vpop.permute.xlu0 %70 }
  0x87   :  { %vm78_vm1 = vcmp.le.f32.partialorder %v49_v23, %v71_v28  ;;  %v98_v29 = vpop.permute.xlu1 %97 }
  0x88   :  { %vm362_vm2 = vmand %vm66_vm0, %vm78_vm1  ;;  %vm104_vm3 = vcmp.le.f32.partialorder %v98_v29, %v49_v23 }
  0x89   :  { %v92_v37 = vsel %vm362_vm2, %v85_v22, 0.0 }
  0x8a   :  { %v94_v46 = vmax.f32 %v92_v37, 0.0 }
  0x8b   :  { %v108_v40 = vpop.permute.xlu0 %107  ;;  %v120_v47 = vpop.permute.xlu1 %119 }
  0x8c   :  { %vm114_vm4 = vcmp.le.f32.partialorder %v49_v23, %v108_v40 }
  0x8d   :  { %vm116_vm5 = vmand %vm104_vm3, %vm114_vm4 }
  0x8e   :  { %v126_v51 = vsel %vm116_vm5, %v120_v47, 0.0 }
  0x8f   :  { %v128_v52 = vmax.f32 %v94_v46, %v126_v51 }
  0x91   :  { %v130_v55 = vadd.f32 1.0, %v128_v52 }
  0x93   :  { %v132_v59 = vmul.f32 %v130_v55, %v130_v55 }
  0x95   :  { %v134_v62 = vmul.f32 0.25, %v132_v59 }
  0x97   :  { %v146_v63 = vsel %vm144_vm8, 0.75, %v134_v62  ;;  %v194_v0 = vsel %vm192_vm9, 0.75, %v134_v62 }
  0x98   :  { %v182_v1 = vmul.f32 %v180_v60, %v146_v63  ;;  %v230_v2 = vmul.f32 %v228_v61, %v194_v0 }
  0x9a   :  { %v232_v3 = vadd.f32 %v230_v2, %v182_v1 }
  0x9c   :  { %v234_v4 = vsel %vm47_vm12, %v232_v3, 0.0 }
  0x9d   :  { %244 = vst [vmem:[#allocation3] sm:$0xff] %v234_v4 }
  0x9e   :  { %285 = shalt.err (!%p282_p4)
}
  0x9f   :  { %s286_s13 = scalar_lea.hbm %s387_s7, 128 }
  0xa0   :  { %p287_p5 = scmp.ne.s32.totalorder %s387_s7, %s286_s13  ;;  %p290_p6 = scmp.lt.u32.totalorder %s286_s13, %s387_s7 }
  0xa2   :  { %p292_p7 = pnand %p290_p6, %p287_p5 }
  0xa4   :  { %295 = shalt.err (!%p292_p7)
}
  0xa5   :  { %254 = dma.vmem_to_hbm [thread:$0]  %s252_s3, 128, %s387_s7, [#allocation4]  }
  0xa6   :  { %296 = dma.done.wait [#allocation4], 128  }
  0xa7   :  { %297 = vsyncadd [#allocation4], 4294967168 }
  0xa8   :  { %258 = vsyncpa [#allocation4], 1 }

</bundles_post_ra>
